<compile_context>
chip_gen: v7x
topology: tpu7x:2x2x1
jax: 0.10.0
libtpu: 0.0.40
codegen_flags: <defaults>
</compile_context>

<pallas_src>
import jax
import jax.numpy as jnp
from jax.experimental import pallas as pl
from jax.experimental.pallas import tpu as pltpu


def conv_as_matmul_kernel(w_ref, p_ref, b_ref, o_ref):
    """Whole Conv2d(3, 64, k=3) as a single matmul.

    w_ref: (Cout, K)   VMEM   reshaped conv weights, K = KH*KW*Cin
    p_ref: (K, M)      VMEM   im2col patches,       M = N*OH*OW
    b_ref: (Cout, 1)   VMEM   bias
    o_ref: (Cout, M)   VMEM   conv output, channel-major (lane-dense M)
    """
    acc = jnp.dot(w_ref[...], p_ref[...], preferred_element_type=jnp.float32)
    o_ref[...] = (acc + b_ref[...]).astype(o_ref.dtype)


@jax.jit
def nutty_forward(x_nchw, w_oihw, bias):
    """Conv2d(3, 64, kernel_size=3) forward: NCHW in / NCHW out."""
    n, cin, h, w = x_nchw.shape
    cout, cin_w, kh, kw = w_oihw.shape
    assert cin == cin_w
    oh, ow = h - kh + 1, w - kw + 1
    k = kh * kw * cin
    m = n * oh * ow

    # ---- layout plumbing / im2col in the wrapper (tiny here, fused by XLA) ----
    x_nhwc = jnp.transpose(x_nchw, (0, 2, 3, 1))          # (N, H, W, Cin)
    taps = [
        x_nhwc[:, i:i + oh, j:j + ow, :]                  # (N, OH, OW, Cin)
        for i in range(kh) for j in range(kw)
    ]
    # Last-axis ordering = (kh, kw, cin), matching the weight reshape below.
    patches = jnp.concatenate(taps, axis=-1)              # (N, OH, OW, K)
    p_km = patches.reshape(m, k).T                        # (K, M)

    w_ck = jnp.transpose(w_oihw, (0, 2, 3, 1)).reshape(cout, k)   # (Cout, K)
    b_c1 = bias.reshape(cout, 1)

    # NOTE: on v6e/v7x, casting w_ck / p_km to bfloat16 (while keeping f32
    # accumulation via preferred_element_type) hits the bf16-native MXU fast
    # path; kept in f32 here since the problem is overhead-bound at these
    # shapes and f32 preserves the reference tolerance.

    out_cm = pl.pallas_call(
        conv_as_matmul_kernel,
        out_shape=jax.ShapeDtypeStruct((cout, m), x_nchw.dtype),
        grid=(1,),  # single step: whole batch in one MXU matmul
        in_specs=[
            pl.BlockSpec((cout, k), lambda i: (0, 0)),
            pl.BlockSpec((k, m), lambda i: (0, 0)),
            pl.BlockSpec((cout, 1), lambda i: (0, 0)),
        ],
        out_specs=pl.BlockSpec((cout, m), lambda i: (0, 0)),
        compiler_params=pltpu.CompilerParams(
            dimension_semantics=("arbitrary",)
        ),
    )(w_ck, p_km, b_c1)

    # (Cout, N*OH*OW) -> (N, Cout, OH, OW): outer-dim reshape/transpose only.
    return jnp.transpose(out_cm.reshape(cout, n, oh, ow), (1, 0, 2, 3))


if __name__ == "__main__":
    key = jax.random.PRNGKey(0)
    kx, kw_, kb = jax.random.split(key, 3)

    # Shapes consistent with Conv2d(3, 64, kernel_size=3): N=2, C=3, 16x16.
    x = jax.random.normal(kx, (2, 3, 16, 16), dtype=jnp.float32)

    # Deterministic PyTorch-style uniform(-bound, bound), bound = 1/sqrt(fan_in).
    fan_in = 3 * 3 * 3
    bound = 1.0 / jnp.sqrt(jnp.float32(fan_in))
    weight = jax.random.uniform(
        kw_, (64, 3, 3, 3), dtype=jnp.float32, minval=-bound, maxval=bound
    )
    bias = jax.random.uniform(
        kb, (64,), dtype=jnp.float32, minval=-bound, maxval=bound
    )

    out = nutty_forward(x, weight, bias)
    jax.block_until_ready(out)

    # Cross-check against XLA's conv for correctness.
    ref = jax.lax.conv_general_dilated(
        x, weight, window_strides=(1, 1), padding="VALID",
        dimension_numbers=("NCHW", "OIHW", "NCHW"),
    ) + bias[None, :, None, None]
    assert out.shape == (2, 64, 14, 14), out.shape
    assert jnp.allclose(out, ref, atol=1e-4, rtol=1e-4), float(
        jnp.max(jnp.abs(out - ref))
    )

    print("KERNEL_OK")
</pallas_src>

<mosaic_0001>
module attributes {stable_mosaic.version = 11 : i64} {
  func.func @conv_as_matmul_kernel(%arg0: i32, %arg1: memref<64x27xf32, #tpu.memory_space<vmem>>, %arg2: memref<27x392xf32, #tpu.memory_space<vmem>>, %arg3: memref<64x1xf32, #tpu.memory_space<vmem>>, %arg4: memref<64x392xf32, #tpu.memory_space<vmem>>) attributes {dimension_semantics = [#tpu.dimension_semantics<arbitrary>], iteration_bounds = array<i64: 1>, scalar_prefetch = 0 : i64, scratch_operands = 0 : i64, tpu.core_type = #tpu.core_type<tc>, window_params = [{pipeline_mode = #tpu.pipeline_mode<synchronous>, transform_indices = @transform_0, window_bounds = array<i64: 64, 27>}, {pipeline_mode = #tpu.pipeline_mode<synchronous>, transform_indices = @transform_1, window_bounds = array<i64: 27, 392>}, {pipeline_mode = #tpu.pipeline_mode<synchronous>, transform_indices = @transform_2, window_bounds = array<i64: 64, 1>}, {pipeline_mode = #tpu.pipeline_mode<synchronous>, transform_indices = @transform_3, window_bounds = array<i64: 64, 392>}]} {
    %c0 = arith.constant 0 : index
    %c0_0 = arith.constant 0 : index
    %0 = vector.load %arg1[%c0, %c0_0] : memref<64x27xf32, #tpu.memory_space<vmem>>, vector<64x27xf32>
    %c0_1 = arith.constant 0 : index
    %c0_2 = arith.constant 0 : index
    %1 = vector.load %arg2[%c0_1, %c0_2] : memref<27x392xf32, #tpu.memory_space<vmem>>, vector<27x392xf32>
    %cst = arith.constant dense<0.000000e+00> : vector<64x392xf32>
    %2 = tpu.matmul %0, %1, %cst {dimension_numbers = #tpu.dot_dimension_numbers<[1], [0], [0], [1], [0, 0, 1, 1], [], []>} : vector<64x27xf32>, vector<27x392xf32>, vector<64x392xf32> -> vector<64x392xf32>
    %c0_3 = arith.constant 0 : index
    %c0_4 = arith.constant 0 : index
    %3 = vector.load %arg3[%c0_3, %c0_4] : memref<64x1xf32, #tpu.memory_space<vmem>>, vector<64x1xf32>
    %4 = vector.broadcast %3 : vector<64x1xf32> to vector<64x392xf32>
    %5 = arith.addf %2, %4 : vector<64x392xf32>
    %c0_5 = arith.constant 0 : index
    %c0_6 = arith.constant 0 : index
    %6 = vector.load %arg4[%c0_5, %c0_6] : memref<64x392xf32, #tpu.memory_space<vmem>>, vector<64x392xf32>
    tpu.vector_store %arg4[%c0_5, %c0_6], %5 {strides = array<i32>} : memref<64x392xf32, #tpu.memory_space<vmem>>, vector<64x392xf32>,
    return
  }
  func.func @transform_0(%arg0: i32) -> (i32, i32) {
    %c0_i32 = arith.constant 0 : i32
    %c0_i32_0 = arith.constant 0 : i32
    %c0_i32_1 = arith.constant 0 : i32
    return %c0_i32, %c0_i32_0 : i32, i32
  }
  func.func @transform_1(%arg0: i32) -> (i32, i32) {
    %c0_i32 = arith.constant 0 : i32
    %c0_i32_0 = arith.constant 0 : i32
    %c0_i32_1 = arith.constant 0 : i32
    return %c0_i32, %c0_i32_0 : i32, i32
  }
  func.func @transform_2(%arg0: i32) -> (i32, i32) {
    %c0_i32 = arith.constant 0 : i32
    %c0_i32_0 = arith.constant 0 : i32
    %c0_i32_1 = arith.constant 0 : i32
    return %c0_i32, %c0_i32_0 : i32, i32
  }
  func.func @transform_3(%arg0: i32) -> (i32, i32) {
    %c0_i32 = arith.constant 0 : i32
    %c0_i32_0 = arith.constant 0 : i32
    %c0_i32_1 = arith.constant 0 : i32
    return %c0_i32, %c0_i32_0 : i32, i32
  }
}

</mosaic_0001>

<bundles_post_ra>
// kernel: nutty_forward.1
= control target key start
LH: loop header
LB: loop body
LE: loop exit
PB: predicated region body
PF: predicated region fallthrough
CT: control target
= control target key end

     0   :  { %vm111_vm0 = vcmask 1042432   ;;  %v432_v3 = vmov 0.0   ;;  %v433_v8 = vmov 0   ;;  %vm434_vm1 = vmmov 1   ;;  %s700_s1 = inlined_call_operand.vmem [shape: f32[27,392], index: 1, kind: input, shape index: {}]   ;;  %s701_s0 = inlined_call_operand.vmem [shape: f32[64,27], index: 0, kind: input, shape index: {}]   ;;  %s702_s2 = inlined_call_operand.vmem [shape: f32[64,1], index: 2, kind: input, shape index: {}]   ;;  %s703_s3 = inlined_call_operand.vmem [shape: f32[64,392], index: 3, kind: output, shape index: {}]  }
   0x1   :  { %v23_v0 = vld [vmem:[%s700_s1 + $0x8] sm:$0xff]  ;;  %v25_v2 = vld [vmem:[%s700_s1 + $0x18] sm:$0xff]  ;;  %188 = vmatprep.mubr.f32.mxu0 %v432_v3  ;;  %301 = vmatprep.mubr.f32.mxu1 %v432_v3  ;;  %v22_v6 = vld [vmem:[%s700_s1] sm:$0xff]  ;;  %vm86_vm3 = vcmask 220160   ;;  %vm353_vm4 = vcmask 64512  }
   0x2   :  { %v27_v1 = vld [vmem:[%s700_s1 + $0x28] sm:$0xff]  ;;  %v29_v5 = vld [vmem:[%s700_s1 + $0x38] sm:$0xff]  ;;  %v26_v7 = vld [vmem:[%s700_s1 + $0x20] sm:$0xff]  ;;  %430 = vset.pattern.permute.xlu0 %v433_v8  ;;  %431 = vset.pattern.permute.xlu1 %v433_v8 }
   0x3   :  { %v407_v4 = vpack.c.bf16 %v27_v1, %v23_v0  ;;  %v417_v9 = vpack.c.bf16 %v29_v5, %v25_v2  ;;  %v409_v10 = vpack.c.bf16 %v26_v7, %v22_v6  ;;  %v24_v11 = vld [vmem:[%s700_s1 + $0x10] sm:$0xff]  ;;  %v31_v13 = vld [vmem:[%s700_s1 + $0x48] sm:$0xff]  ;;  %vm488_vm2 = vmpackc.low %vm111_vm0, %vm434_vm1 }
   0x4   :  { %v28_v12 = vld [vmem:[%s700_s1 + $0x30] sm:$0xff]  ;;  %v35_v15 = vld [vmem:[%s700_s1 + $0x68] sm:$0x7]  ;;  %v33_v17 = vld [vmem:[%s700_s1 + $0x58] sm:$0xff] }
   0x5   :  { %408 = vmatprep.subr.bf16.mxu0 %v407_v4  ;;  %v419_v14 = vpack.c.bf16 %v28_v12, %v24_v11  ;;  %418 = vmatprep.subr.bf16.mxu1 %v417_v9  ;;  %v411_v18 = vpack.c.bf16 %v35_v15, %v31_v13  ;;  %v37_v19 = vld [vmem:[%s700_s1 + $0x78] sm:$0x7]  ;;  %v30_v20 = vld [vmem:[%s700_s1 + $0x40] sm:$0xff]  ;;  %v32_v24 = vld [vmem:[%s700_s1 + $0x50] sm:$0xff] }
   0x6   :  { %410 = vmatpush1.bf16.msra.mxu0 %v409_v10  ;;  %v34_v21 = vld [vmem:[%s700_s1 + $0x60] sm:$0x7]  ;;  %v421_v22 = vpack.c.bf16 %v37_v19, %v33_v17  ;;  %v36_v25 = vld [vmem:[%s700_s1 + $0x70] sm:$0x7]  ;;  %v39_v30 = vld [vmem:[%s702_s2 + $0x8] sm:$0xff] }
   0x7   :  { %420 = vmatpush1.bf16.msra.mxu1 %v419_v14  ;;  %v414_v23 = vpack.c.bf16 %v34_v21, %v30_v20  ;;  %413 = vmatprep.subr.msk.bf16.mxu0 %vm488_vm2, %v411_v18  ;;  %v424_v26 = vpack.c.bf16 %v36_v25, %v32_v24  ;;  %v14_v27 = vld [vmem:[%s701_s0] sm:$0xff]  ;;  %v40_v29 = vld [vmem:[%s702_s2 + $0x10] sm:$0xff]  ;;  %v41_v31 = vld [vmem:[%s702_s2 + $0x18] sm:$0xff] }
   0x8   :  { %423 = vmatprep.subr.msk.bf16.mxu1 %vm488_vm2, %v421_v22  ;;  %v38_v28 = vld [vmem:[%s702_s2] sm:$0xff]  ;;  %58 = vperm.xlu1 %431, %v40_v29   ;;  %v15_v32 = vld [vmem:[%s701_s0 + $0x8] sm:$0xff]  ;;  %v16_v35 = vld [vmem:[%s701_s0 + $0x10] sm:$0xff] }
   0x9   :  { %48 = vperm.xlu0 %430, %v38_v28   ;;  %v42_v33 = vld [vmem:[%s702_s2 + $0x20] sm:$0xff]  ;;  %v43_v34 = vld [vmem:[%s702_s2 + $0x28] sm:$0xff]  ;;  %v44_v36 = vld [vmem:[%s702_s2 + $0x30] sm:$0xff] }
   0xa   :  { %416 = vmatpush1.bf16.msk.msra.mxu0 %vm488_vm2, %v414_v23  ;;  %v45_v37 = vld [vmem:[%s702_s2 + $0x38] sm:$0xff]  ;;  %v18_v39 = vld [vmem:[%s701_s0 + $0x20] sm:$0xff]  ;;  %v19_v40 = vld [vmem:[%s701_s0 + $0x28] sm:$0xff] }
   0xb   :  { %426 = vmatpush1.bf16.msk.msra.mxu1 %vm488_vm2, %v424_v26  ;;  %v17_v38 = vld [vmem:[%s701_s0 + $0x18] sm:$0xff]  ;;  %v20_v41 = vld [vmem:[%s701_s0 + $0x30] sm:$0xff] }
   0xc   :  { %63 = vperm.xlu1 %431, %v41_v31   ;;  %v21_v42 = vld [vmem:[%s701_s0 + $0x38] sm:$0xff] }
   0xd   :  { %389 = vmatmul.mubr.msk.f32.vlgmr.msra.gmra.mrb[0].mxu0 %vm86_vm3, %v14_v27  ;;  %53 = vperm.xlu0 %430, %v39_v30  }
   0xe   :  { %399 = vmatmul.mubr.msk.f32.vlgmr.msra.gmra.mrb[0].mxu1 %vm86_vm3, %v14_v27  ;;  %194 = vmatprep.mubr.f32.mxu0 %v432_v3 }
   0xf   :  { %307 = vmatprep.mubr.f32.mxu1 %v432_v3 }
  0x10   :  { %73 = vperm.xlu1 %431, %v43_v34  }
  0x11   :  { %390 = vmatmul.mubr.msk.f32.gmra.mrb[2].mxu0 %vm86_vm3, %v15_v32  ;;  %68 = vperm.xlu0 %430, %v42_v33  }
  0x12   :  { %400 = vmatmul.mubr.msk.f32.gmra.mrb[2].mxu1 %vm86_vm3, %v15_v32  ;;  %200 = vmatprep.mubr.f32.mxu0 %v432_v3 }
  0x13   :  { %313 = vmatprep.mubr.f32.mxu1 %v432_v3 }
  0x14   :  { %83 = vperm.xlu1 %431, %v45_v37  }
  0x15   :  { %391 = vmatmul.mubr.msk.f32.gmra.mrb[4].mxu0 %vm86_vm3, %v16_v35  ;;  %78 = vperm.xlu0 %430, %v44_v36  }
  0x16   :  { %401 = vmatmul.mubr.msk.f32.gmra.mrb[4].mxu1 %vm86_vm3, %v16_v35  ;;  %206 = vmatprep.mubr.f32.mxu0 %v432_v3 }
  0x17   :  { %319 = vmatprep.mubr.f32.mxu1 %v432_v3 }
  0x19   :  { %392 = vmatmul.mubr.msk.f32.gmra.mrb[6].mxu0 %vm86_vm3, %v17_v38 }
  0x1a   :  { %402 = vmatmul.mubr.msk.f32.gmra.mrb[6].mxu1 %vm86_vm3, %v17_v38  ;;  %212 = vmatprep.mubr.f32.mxu0 %v432_v3 }
  0x1b   :  { %325 = vmatprep.mubr.f32.mxu1 %v432_v3 }
  0x1d   :  { %393 = vmatmul.mubr.msk.f32.gmra.mrb[8].mxu0 %vm86_vm3, %v18_v39 }
  0x1e   :  { %403 = vmatmul.mubr.msk.f32.gmra.mrb[8].mxu1 %vm86_vm3, %v18_v39  ;;  %218 = vmatprep.mubr.f32.mxu0 %v432_v3 }
  0x1f   :  { %331 = vmatprep.mubr.f32.mxu1 %v432_v3 }
  0x21   :  { %394 = vmatmul.mubr.msk.f32.gmra.mrb[10].mxu0 %vm86_vm3, %v19_v40 }
  0x22   :  { %404 = vmatmul.mubr.msk.f32.gmra.mrb[10].mxu1 %vm86_vm3, %v19_v40  ;;  %224 = vmatprep.mubr.f32.mxu0 %v432_v3 }
  0x23   :  { %337 = vmatprep.mubr.f32.mxu1 %v432_v3 }
  0x25   :  { %395 = vmatmul.mubr.msk.f32.gmra.mrb[12].mxu0 %vm86_vm3, %v20_v41 }
  0x26   :  { %405 = vmatmul.mubr.msk.f32.gmra.mrb[12].mxu1 %vm86_vm3, %v20_v41  ;;  %230 = vmatprep.mubr.f32.mxu0 %v432_v3 }
  0x27   :  { %343 = vmatprep.mubr.f32.mxu1 %v432_v3 }
  0x29   :  { %396 = vmatmul.mubr.msk.f32.gmra.mrb[14].mxu0 %vm86_vm3, %v21_v42 }
  0x2a   :  { %406 = vmatmul.mubr.msk.f32.gmra.mrb[14].mxu1 %vm86_vm3, %v21_v42 }
  0x87   :  { %v59_v58 = vpop.permute.xlu1 %58 }
  0x88   :  { %v49_v43 = vpop.permute.xlu0 %48 }
  0x8b   :  { %v64_v6 = vpop.permute.xlu1 %63 }
  0x8c   :  { %v54_v51 = vpop.permute.xlu0 %53 }
  0x8f   :  { %v74_v24 = vpop.permute.xlu1 %73 }
  0x90   :  { %v69_v15 = vpop.permute.xlu0 %68 }
  0x93   :  { %v84_v42 = vpop.permute.xlu1 %83 }
  0x94   :  { %v79_v33 = vpop.permute.xlu0 %78 }
  0xe0   :  { %v190_v44 = vpop.f32.mrb[0].mxu0 }
  0xe1   :  { %v191_v45 = vadd.f32 %v190_v44, %v49_v43  ;;  %v303_v46 = vpop.f32.mrb[0].mxu1  ;;  %v192_v47 = vpop.f32.mrb[1].mxu0 }
  0xe2   :  { %v304_v48 = vadd.f32 %v303_v46, %v49_v43  ;;  %v193_v49 = vadd.f32 %v192_v47, %v49_v43  ;;  %v305_v50 = vpop.f32.mrb[1].mxu1 }
  0xe3   :  { %350 = vst [vmem:[%s703_s3] sm:$0xff] %v191_v45  ;;  %v306_v52 = vadd.f32 %v305_v50, %v49_v43 }
  0xe4   :  { %352 = vst [vmem:[%s703_s3 + $0x10] sm:$0xff] %v304_v48  ;;  %351 = vst [vmem:[%s703_s3 + $0x8] sm:$0xff] %v193_v49  ;;  %v196_v53 = vpop.f32.mrb[2].mxu0 }
  0xe5   :  { %354 = vst.msk [vmem:[%s703_s3 + $0x18] sm:$0xff] %vm353_vm4, %v306_v52  ;;  %v197_v54 = vadd.f32 %v196_v53, %v54_v51  ;;  %v309_v55 = vpop.f32.mrb[2].mxu1  ;;  %v198_v56 = vpop.f32.mrb[3].mxu0 }
  0xe6   :  { %v310_v57 = vadd.f32 %v309_v55, %v54_v51  ;;  %v199_v59 = vadd.f32 %v198_v56, %v54_v51  ;;  %v311_v60 = vpop.f32.mrb[3].mxu1 }
  0xe7   :  { %355 = vst [vmem:[%s703_s3 + $0x20] sm:$0xff] %v197_v54  ;;  %v312_v61 = vadd.f32 %v311_v60, %v54_v51 }
  0xe8   :  { %357 = vst [vmem:[%s703_s3 + $0x30] sm:$0xff] %v310_v57  ;;  %356 = vst [vmem:[%s703_s3 + $0x28] sm:$0xff] %v199_v59  ;;  %v202_v62 = vpop.f32.mrb[4].mxu0 }
  0xe9   :  { %358 = vst.msk [vmem:[%s703_s3 + $0x38] sm:$0xff] %vm353_vm4, %v312_v61  ;;  %v203_v63 = vadd.f32 %v202_v62, %v59_v58  ;;  %v315_v0 = vpop.f32.mrb[4].mxu1  ;;  %v204_v1 = vpop.f32.mrb[5].mxu0 }
  0xea   :  { %v316_v2 = vadd.f32 %v315_v0, %v59_v58  ;;  %v205_v3 = vadd.f32 %v204_v1, %v59_v58  ;;  %v317_v4 = vpop.f32.mrb[5].mxu1 }
  0xeb   :  { %359 = vst [vmem:[%s703_s3 + $0x40] sm:$0xff] %v203_v63  ;;  %v318_v5 = vadd.f32 %v317_v4, %v59_v58 }
  0xec   :  { %361 = vst [vmem:[%s703_s3 + $0x50] sm:$0xff] %v316_v2  ;;  %360 = vst [vmem:[%s703_s3 + $0x48] sm:$0xff] %v205_v3  ;;  %v208_v7 = vpop.f32.mrb[6].mxu0 }
  0xed   :  { %362 = vst.msk [vmem:[%s703_s3 + $0x58] sm:$0xff] %vm353_vm4, %v318_v5  ;;  %v209_v8 = vadd.f32 %v208_v7, %v64_v6  ;;  %v321_v9 = vpop.f32.mrb[6].mxu1  ;;  %v210_v10 = vpop.f32.mrb[7].mxu0 }
  0xee   :  { %v322_v11 = vadd.f32 %v321_v9, %v64_v6  ;;  %v211_v12 = vadd.f32 %v210_v10, %v64_v6  ;;  %v323_v13 = vpop.f32.mrb[7].mxu1 }
  0xef   :  { %363 = vst [vmem:[%s703_s3 + $0x60] sm:$0xff] %v209_v8  ;;  %v324_v14 = vadd.f32 %v323_v13, %v64_v6 }
  0xf0   :  { %365 = vst [vmem:[%s703_s3 + $0x70] sm:$0xff] %v322_v11  ;;  %364 = vst [vmem:[%s703_s3 + $0x68] sm:$0xff] %v211_v12  ;;  %v214_v16 = vpop.f32.mrb[8].mxu0 }
  0xf1   :  { %366 = vst.msk [vmem:[%s703_s3 + $0x78] sm:$0xff] %vm353_vm4, %v324_v14  ;;  %v215_v17 = vadd.f32 %v214_v16, %v69_v15  ;;  %v327_v18 = vpop.f32.mrb[8].mxu1  ;;  %v216_v19 = vpop.f32.mrb[9].mxu0 }
  0xf2   :  { %v328_v20 = vadd.f32 %v327_v18, %v69_v15  ;;  %v217_v21 = vadd.f32 %v216_v19, %v69_v15  ;;  %v329_v22 = vpop.f32.mrb[9].mxu1 }
  0xf3   :  { %367 = vst [vmem:[%s703_s3 + $0x80] sm:$0xff] %v215_v17  ;;  %v330_v23 = vadd.f32 %v329_v22, %v69_v15 }
  0xf4   :  { %369 = vst [vmem:[%s703_s3 + $0x90] sm:$0xff] %v328_v20  ;;  %368 = vst [vmem:[%s703_s3 + $0x88] sm:$0xff] %v217_v21  ;;  %v220_v25 = vpop.f32.mrb[10].mxu0 }
  0xf5   :  { %370 = vst.msk [vmem:[%s703_s3 + $0x98] sm:$0xff] %vm353_vm4, %v330_v23  ;;  %v221_v26 = vadd.f32 %v220_v25, %v74_v24  ;;  %v333_v27 = vpop.f32.mrb[10].mxu1  ;;  %v222_v28 = vpop.f32.mrb[11].mxu0 }
  0xf6   :  { %v334_v29 = vadd.f32 %v333_v27, %v74_v24  ;;  %v223_v30 = vadd.f32 %v222_v28, %v74_v24  ;;  %v335_v31 = vpop.f32.mrb[11].mxu1 }
  0xf7   :  { %371 = vst [vmem:[%s703_s3 + $0xa0] sm:$0xff] %v221_v26  ;;  %v336_v32 = vadd.f32 %v335_v31, %v74_v24 }
  0xf8   :  { %373 = vst [vmem:[%s703_s3 + $0xb0] sm:$0xff] %v334_v29  ;;  %372 = vst [vmem:[%s703_s3 + $0xa8] sm:$0xff] %v223_v30  ;;  %v226_v34 = vpop.f32.mrb[12].mxu0 }
  0xf9   :  { %374 = vst.msk [vmem:[%s703_s3 + $0xb8] sm:$0xff] %vm353_vm4, %v336_v32  ;;  %v227_v35 = vadd.f32 %v226_v34, %v79_v33  ;;  %v339_v36 = vpop.f32.mrb[12].mxu1  ;;  %v228_v37 = vpop.f32.mrb[13].mxu0 }
  0xfa   :  { %v340_v38 = vadd.f32 %v339_v36, %v79_v33  ;;  %v229_v39 = vadd.f32 %v228_v37, %v79_v33  ;;  %v341_v40 = vpop.f32.mrb[13].mxu1 }
  0xfb   :  { %375 = vst [vmem:[%s703_s3 + $0xc0] sm:$0xff] %v227_v35  ;;  %v342_v41 = vadd.f32 %v341_v40, %v79_v33 }
  0xfc   :  { %377 = vst [vmem:[%s703_s3 + $0xd0] sm:$0xff] %v340_v38  ;;  %376 = vst [vmem:[%s703_s3 + $0xc8] sm:$0xff] %v229_v39  ;;  %v232_v43 = vpop.f32.mrb[14].mxu0 }
  0xfd   :  { %378 = vst.msk [vmem:[%s703_s3 + $0xd8] sm:$0xff] %vm353_vm4, %v342_v41  ;;  %v233_v44 = vadd.f32 %v232_v43, %v84_v42  ;;  %v345_v45 = vpop.f32.mrb[14].mxu1  ;;  %v234_v46 = vpop.f32.mrb[15].mxu0 }
  0xfe   :  { %v346_v47 = vadd.f32 %v345_v45, %v84_v42  ;;  %v235_v48 = vadd.f32 %v234_v46, %v84_v42  ;;  %v347_v49 = vpop.f32.mrb[15].mxu1 }
  0xff   :  { %379 = vst [vmem:[%s703_s3 + $0xe0] sm:$0xff] %v233_v44  ;;  %v348_v50 = vadd.f32 %v347_v49, %v84_v42 }
 0x100   :  { %381 = vst [vmem:[%s703_s3 + $0xf0] sm:$0xff] %v346_v47  ;;  %380 = vst [vmem:[%s703_s3 + $0xe8] sm:$0xff] %v235_v48 }
 0x101   :  { %382 = vst.msk [vmem:[%s703_s3 + $0xf8] sm:$0xff] %vm353_vm4, %v348_v50 }

</bundles_post_ra>
